<compile_context>
chip_gen: v5e
topology: v5e:2x2
jax: 0.10.0
libtpu: 0.0.40
codegen_flags: <defaults>
</compile_context>

<pallas_src>
import math

import jax
import jax.numpy as jnp
from jax.experimental import pallas as pl
from jax.experimental.pallas import tpu as pltpu


# ---------------------------------------------------------------------------
# Kernels
# ---------------------------------------------------------------------------
def _pe_eval_kernel(x_ref, pe_ref, o_ref):
    # x_ref: (TILE_S, B, D), pe_ref: (TILE_S, D) -> broadcast over batch axis.
    o_ref[...] = (x_ref[...] + pe_ref[...][:, None, :]).astype(o_ref.dtype)


def _pe_train_kernel(x_ref, pe_ref, m_ref, o_ref):
    # m_ref holds the pre-scaled keep mask: 0 or 1/(1-p), same dtype as x.
    y = x_ref[...] + pe_ref[...][:, None, :]
    o_ref[...] = (y * m_ref[...]).astype(o_ref.dtype)


# ---------------------------------------------------------------------------
# PE table (identical to the PyTorch buffer)
# ---------------------------------------------------------------------------
def make_pe_table(d_model: int, max_len: int = 5000, dtype=jnp.float32):
    position = jnp.arange(max_len, dtype=jnp.float32)[:, None]            # (L, 1)
    div_term = jnp.exp(
        jnp.arange(0, d_model, 2, dtype=jnp.float32)
        * (-math.log(10000.0) / d_model)
    )                                                                     # (D/2,)
    pe = jnp.zeros((max_len, 1, d_model), dtype=jnp.float32)
    pe = pe.at[:, 0, 0::2].set(jnp.sin(position * div_term))
    pe = pe.at[:, 0, 1::2].set(jnp.cos(position * div_term))
    return pe.astype(dtype)


# ---------------------------------------------------------------------------
# Wrapper
# ---------------------------------------------------------------------------
def _choose_tile_s(S: int, B: int, D: int, itemsize: int,
                   target_bytes: int = 4 * 1024 * 1024) -> int:
    """Pick a sequence tile giving ~4 MiB x-blocks (fits every chip's scoped
    VMEM with double buffering), rounded to a multiple of 8 so the 2-D pe
    block stays sublane-aligned."""
    rows = max(1, target_bytes // max(1, B * D * itemsize))
    if rows >= S:
        return S
    return max(8, (rows // 8) * 8)


def positional_encoding(x, pe, *, dropout_p: float = 0.1, train: bool = False,
                        rng_key=None, tile_s: int | None = None):
    """x: [seq_len, batch, d_model]; pe: [max_len, 1, d_model]."""
    S, B, D = x.shape
    pe_s = pe[:S].reshape(S, D)                      # dense 2-D (S, D) slab

    itemsize = jnp.dtype(x.dtype).itemsize
    if tile_s is None:
        tile_s = _choose_tile_s(S, B, D, itemsize)
    grid = (pl.cdiv(S, tile_s),)

    x_spec = pl.BlockSpec((tile_s, B, D), lambda i: (i, 0, 0))
    pe_spec = pl.BlockSpec((tile_s, D), lambda i: (i, 0))
    out_spec = pl.BlockSpec((tile_s, B, D), lambda i: (i, 0, 0))

    compiler_params = pltpu.CompilerParams(
        # Every seq-tile is independent -> shard across TensorCores on v7x.
        dimension_semantics=("parallel",),
        # Blocks are sized ~4 MiB, so this is comfortable headroom on
        # v5e/v6e/v7x while allowing larger user-chosen tiles.
        vmem_limit_bytes=64 * 1024 * 1024,
    )

    use_dropout = bool(train) and float(dropout_p) > 0.0
    if not use_dropout:
        return pl.pallas_call(
            _pe_eval_kernel,
            out_shape=jax.ShapeDtypeStruct((S, B, D), x.dtype),
            grid=grid,
            in_specs=[x_spec, pe_spec],
            out_specs=out_spec,
            compiler_params=compiler_params,
        )(x, pe_s)

    if rng_key is None:
        rng_key = jax.random.PRNGKey(0)
    p = float(dropout_p)
    keep = jax.random.bernoulli(rng_key, 1.0 - p, (S, B, D))
    # Pre-scaled keep mask: 0 or 1/(1-p), in x's dtype (one multiply in-kernel).
    mask = keep.astype(x.dtype) * jnp.asarray(1.0 / (1.0 - p), dtype=x.dtype)

    return pl.pallas_call(
        _pe_train_kernel,
        out_shape=jax.ShapeDtypeStruct((S, B, D), x.dtype),
        grid=grid,
        in_specs=[x_spec, pe_spec, x_spec],          # mask tiled like x
        out_specs=out_spec,
        compiler_params=compiler_params,
    )(x, pe_s, mask)


# ---------------------------------------------------------------------------
# Demo / self-test
# ---------------------------------------------------------------------------
if __name__ == "__main__":
    SEQ, BATCH, D_MODEL, MAX_LEN = 8, 2, 32, 64

    key = jax.random.PRNGKey(0)
    x = jax.random.normal(key, (SEQ, BATCH, D_MODEL), dtype=jnp.float32)
    pe = make_pe_table(D_MODEL, MAX_LEN)

    ref = x + pe[:SEQ]                               # broadcast over batch

    # Eval-mode forward (dropout is identity).
    out_eval = jax.block_until_ready(
        positional_encoding(x, pe, dropout_p=0.1, train=False))
    assert out_eval.shape == (SEQ, BATCH, D_MODEL)
    assert jnp.allclose(out_eval, ref, atol=1e-6, rtol=1e-6)

    # Train-mode forward (inverted dropout).  The mask is a deterministic
    # function of the key, so we can reconstruct the exact reference.
    p = 0.1
    drop_key = jax.random.PRNGKey(1234)
    out_train = jax.block_until_ready(
        positional_encoding(x, pe, dropout_p=p, train=True, rng_key=drop_key))
    keep_ref = jax.random.bernoulli(drop_key, 1.0 - p, x.shape)
    ref_train = ref * keep_ref.astype(x.dtype) / (1.0 - p)
    assert jnp.allclose(out_train, ref_train, atol=1e-6, rtol=1e-6)

    # Inverted-dropout invariant: every element is 0 or (x+pe)/(1-p).
    scaled = ref / (1.0 - p)
    ok = jnp.logical_or(jnp.isclose(out_train, 0.0, atol=1e-6),
                        jnp.isclose(out_train, scaled, atol=1e-5, rtol=1e-5))
    assert bool(jnp.all(ok))

    print("KERNEL_OK")
</pallas_src>

<mosaic_0001>
module attributes {stable_mosaic.version = 11 : i64} {
  func.func @_pe_eval_kernel(%arg0: i32, %arg1: memref<8x2x32xf32, #tpu.memory_space<vmem>>, %arg2: memref<8x32xf32, #tpu.memory_space<vmem>>, %arg3: memref<8x2x32xf32, #tpu.memory_space<vmem>>) attributes {dimension_semantics = [#tpu.dimension_semantics<parallel>], iteration_bounds = array<i64: 1>, scalar_prefetch = 0 : i64, scratch_operands = 0 : i64, tpu.core_type = #tpu.core_type<tc>, window_params = [{transform_indices = @transform_0, window_bounds = array<i64: 8, 2, 32>}, {transform_indices = @transform_1, window_bounds = array<i64: 8, 32>}, {transform_indices = @transform_2, window_bounds = array<i64: 8, 2, 32>}]} {
    %c0 = arith.constant 0 : index
    %c0_0 = arith.constant 0 : index
    %c0_1 = arith.constant 0 : index
    %0 = vector.load %arg1[%c0, %c0_0, %c0_1] : memref<8x2x32xf32, #tpu.memory_space<vmem>>, vector<8x2x32xf32>
    %c0_2 = arith.constant 0 : index
    %c0_3 = arith.constant 0 : index
    %1 = vector.load %arg2[%c0_2, %c0_3] : memref<8x32xf32, #tpu.memory_space<vmem>>, vector<8x32xf32>
    %2 = vector.shape_cast %1 : vector<8x32xf32> to vector<8x1x32xf32>
    %3 = vector.broadcast %2 : vector<8x1x32xf32> to vector<8x2x32xf32>
    %4 = arith.addf %0, %3 : vector<8x2x32xf32>
    %c0_4 = arith.constant 0 : index
    %c0_5 = arith.constant 0 : index
    %c0_6 = arith.constant 0 : index
    %5 = vector.load %arg3[%c0_4, %c0_5, %c0_6] : memref<8x2x32xf32, #tpu.memory_space<vmem>>, vector<8x2x32xf32>
    tpu.vector_store %arg3[%c0_4, %c0_5, %c0_6], %4 {strides = array<i32>} : memref<8x2x32xf32, #tpu.memory_space<vmem>>, vector<8x2x32xf32>,
    return
  }
  func.func @transform_0(%arg0: i32) -> (i32, i32, i32) {
    %c0_i32 = arith.constant 0 : i32
    %c0_i32_0 = arith.constant 0 : i32
    %c0_i32_1 = arith.constant 0 : i32
    return %arg0, %c0_i32, %c0_i32_0 : i32, i32, i32
  }
  func.func @transform_1(%arg0: i32) -> (i32, i32) {
    %c0_i32 = arith.constant 0 : i32
    %c0_i32_0 = arith.constant 0 : i32
    return %arg0, %c0_i32 : i32, i32
  }
  func.func @transform_2(%arg0: i32) -> (i32, i32, i32) {
    %c0_i32 = arith.constant 0 : i32
    %c0_i32_0 = arith.constant 0 : i32
    %c0_i32_1 = arith.constant 0 : i32
    return %arg0, %c0_i32, %c0_i32_0 : i32, i32, i32
  }
}

</mosaic_0001>

<bundles_post_ra>
// kernel: tpu_custom_call.1
= control target key start
LH: loop header
LB: loop body
LE: loop exit
PB: predicated region body
PF: predicated region fallthrough
CT: control target
= control target key end

     0   :  { %7 = vsyncpa [#allocation3], 0  ;;  %s238_s0 = inlined_call_operand.hbm [shape: f32[8,2,32], index: 0, kind: input, shape index: {}]   ;;  %s239_s1 = inlined_call_operand.hbm [shape: f32[8,32], index: 1, kind: input, shape index: {}]   ;;  %s240_s2 = inlined_call_operand.hbm [shape: f32[8,2,32], index: 2, kind: output, shape index: {}]  }
   0x1   :  { %8 = vsyncpa [#allocation6], 0 }
   0x2   :  { %9 = vsyncpa [#allocation4], 0  ;;  %s14_s11 = sshll.u32 %s238_s0, 4  ;;  %s195_s12 = smov [#allocation2]   ;;  %s15_s11 = int_to_ptr.hbm [resolvable:$true] %s14_s11 }
   0x3   :  { %s16_s13 = sshll.u32 %s195_s12, 4  ;;  %s28_s16 = sshll.u32 %s239_s1, 4  ;;  %s17_s13 = int_to_ptr.vmem [resolvable:$true] %s16_s13  ;;  %s29_s16 = int_to_ptr.hbm [resolvable:$true] %s28_s16 }
   0x4   :  { %s196_s17 = smov 32   ;;  %s197_s18 = smov 2  }
   0x5   :  { %22 = dma.hbm_to_vmem [thread:$0]  %s15_s11, 256, %s17_s13, [#allocation3], %s196_s17, %s196_s17, %s197_s18  }
   0x6   :  { %s198_s19 = smov [#allocation5]  }
   0x7   :  { %s30_s20 = sshll.u32 %s198_s19, 4  ;;  %s31_s20 = int_to_ptr.vmem [resolvable:$true] %s30_s20 }
   0x8   :  { %33 = dma.hbm_to_vmem [thread:$0]  %s29_s16, 128, %s31_s20, [#allocation6]  }
   0x9   :  { %189 = dma.done.wait [#allocation3], 256  }
   0xa   :  { %190 = vsyncadd [#allocation3], 4294967040 }
   0xb   :  { %191 = dma.done.wait [#allocation6], 128  }
   0xc   :  { %192 = vsyncadd [#allocation6], 4294967168  ;;  %v42_v0 = vld [vmem:[#allocation2] sm:$0x3]  ;;  %v50_v1 = vld [vmem:[#allocation5] sm:$0xff]  ;;  %vm83_vm0 = vcmask 254976  }
   0xd   :  { %v59_v2 = vperm.slane %v50_v1, 0  ;;  %v43_v3 = vld [vmem:[#allocation2 + $0x2] sm:$0x3]  ;;  %v52_v4 = vrot.slane %v50_v1, 1  ;;  %v53_v5 = vrot.slane %v50_v1, 2  ;;  %v54_v6 = vrot.slane %v50_v1, 3 }
   0xe   :  { %v44_v7 = vld [vmem:[#allocation2 + $0x4] sm:$0x3]  ;;  %v45_v8 = vld [vmem:[#allocation2 + $0x6] sm:$0x3]  ;;  %v55_v9 = vrot.slane %v50_v1, 4  ;;  %v56_v10 = vrot.slane %v50_v1, 5 }
   0xf   :  { %v75_v11 = vadd.f32 %v59_v2, %v42_v0  ;;  %v60_v12 = vperm.slane %v52_v4, 0  ;;  %v61_v13 = vperm.slane %v53_v5, 0  ;;  %v62_v14 = vperm.slane %v54_v6, 0  ;;  %v46_v15 = vld [vmem:[#allocation2 + $0x8] sm:$0x3]  ;;  %s199_s0 = smov [#allocation7]  }
  0x10   :  { %v63_v16 = vperm.slane %v55_v9, 0  ;;  %v47_v17 = vld [vmem:[#allocation2 + $0xa] sm:$0x3]  ;;  %v64_v18 = vperm.slane %v56_v10, 0  ;;  %v57_v19 = vrot.slane %v50_v1, 6  ;;  %v58_v20 = vrot.slane %v50_v1, 7 }
  0x11   :  { %84 = vst.msk [vmem:[#allocation7] sm:$0x3] %vm83_vm0, %v75_v11  ;;  %v76_v21 = vadd.f32 %v60_v12, %v43_v3  ;;  %v77_v22 = vadd.f32 %v61_v13, %v44_v7  ;;  %v78_v23 = vadd.f32 %v62_v14, %v45_v8  ;;  %v48_v24 = vld [vmem:[#allocation2 + $0xc] sm:$0x3]  ;;  %v49_v27 = vld [vmem:[#allocation2 + $0xe] sm:$0x3] }
  0x12   :  { %v79_v25 = vadd.f32 %v63_v16, %v46_v15  ;;  %v65_v26 = vperm.slane %v57_v19, 0  ;;  %v66_v28 = vperm.slane %v58_v20, 0  ;;  %v80_v29 = vadd.f32 %v64_v18, %v47_v17  ;;  %s96_s1 = sshll.u32 %s199_s0, 4  ;;  %s98_s23 = sshll.u32 %s240_s2, 4  ;;  %s97_s1 = int_to_ptr.vmem [resolvable:$true] %s96_s1  ;;  %s99_s23 = int_to_ptr.hbm [resolvable:$true] %s98_s23 }
  0x13   :  { %85 = vst.msk [vmem:[#allocation7 + $0x2] sm:$0x3] %vm83_vm0, %v76_v21 }
  0x14   :  { %86 = vst.msk [vmem:[#allocation7 + $0x4] sm:$0x3] %vm83_vm0, %v77_v22  ;;  %v81_v30 = vadd.f32 %v65_v26, %v48_v24  ;;  %v82_v31 = vadd.f32 %v66_v28, %v49_v27 }
  0x15   :  { %87 = vst.msk [vmem:[#allocation7 + $0x6] sm:$0x3] %vm83_vm0, %v78_v23 }
  0x16   :  { %88 = vst.msk [vmem:[#allocation7 + $0x8] sm:$0x3] %vm83_vm0, %v79_v25 }
  0x17   :  { %89 = vst.msk [vmem:[#allocation7 + $0xa] sm:$0x3] %vm83_vm0, %v80_v29 }
  0x18   :  { %90 = vst.msk [vmem:[#allocation7 + $0xc] sm:$0x3] %vm83_vm0, %v81_v30 }
  0x19   :  { %91 = vst.msk [vmem:[#allocation7 + $0xe] sm:$0x3] %vm83_vm0, %v82_v31 }
  0x1a   :  { %104 = dma.vmem_to_hbm [thread:$0]  %s97_s1, 256, %s99_s23, [#allocation4], %s196_s17, %s196_s17, %s197_s18  }
  0x1b   :  { %193 = dma.done.wait [#allocation4], 256  }
  0x1c   :  { %194 = vsyncadd [#allocation4], 4294967040 }
  0x1d   :  { %109 = vsyncpa [#allocation3], 1 }
  0x1e   :  { %110 = vsyncpa [#allocation6], 1 }
  0x1f   :  { %111 = vsyncpa [#allocation4], 1 }

</bundles_post_ra>
